<compile_context>
chip_gen: v5e
topology: v5e:2x2
jax: 0.10.0
libtpu: 0.0.40
codegen_flags: <defaults>
</compile_context>

<pallas_src>
import jax
import jax.numpy as jnp
from jax.experimental import pallas as pl
from jax.experimental.pallas import tpu as pltpu


def _head_kernel(xcol_ref, w1_ref, scale_ref, shift_ref, w2_ref, b2_ref, out_ref):
    # xcol_ref : (1, 9C, HW)  bf16  im2col columns of one batch element
    # w1_ref   : (C, 9C)      bf16  3x3 conv weights, rows=out_ch, cols=(tap, in_ch)
    # scale_ref: (C, 1)       f32   folded BatchNorm scale
    # shift_ref: (C, 1)       f32   folded BatchNorm shift (conv1 bias folded in)
    # w2_ref   : (Cout, C)    bf16  1x1 conv weights
    # b2_ref   : (Cout, 1)    f32   1x1 conv bias
    # out_ref  : (1, Cout, HW) f32  lane-dense output (HW is a multiple of 128)
    acc = jnp.dot(w1_ref[...], xcol_ref[0],
                  preferred_element_type=jnp.float32)                  # (C, HW) MXU
    hidden = jnp.maximum(acc * scale_ref[...] + shift_ref[...], 0.0)   # f32 VPU
    y = jnp.dot(w2_ref[...], hidden.astype(jnp.bfloat16),
                preferred_element_type=jnp.float32)                    # (Cout, HW)
    out_ref[...] = (y + b2_ref[...])[None].astype(out_ref.dtype)


@jax.jit
def fused_head(x, w1, b1, gamma, beta, run_mean, run_var, w2, b2, eps=1e-5):
    """Conv2d(C,C,3,p=1) -> BatchNorm2d(eval) -> ReLU -> Conv2d(C,Cout,1).

    x : (B, C, H, W) f32 (NCHW);  w1: (C, C, 3, 3) OIHW;  w2: (Cout, C, 1, 1).
    Returns (B, Cout, H, W) f32.
    """
    B, C, H, W = x.shape
    Cout = w2.shape[0]
    HW = H * W

    # Fold conv1 bias + BatchNorm (eval mode) into per-channel scale/shift:
    #   BN(conv + b1) = scale * conv + (scale*(b1 - mean) + beta)
    scale = gamma / jnp.sqrt(run_var + eps)
    shift = scale * (b1 - run_mean) + beta

    # im2col, NCHW-native: rows ordered (tap, in_ch); columns are the H*W pixels.
    xp = jnp.pad(x, ((0, 0), (0, 0), (1, 1), (1, 1)))
    taps = [xp[:, :, dy:dy + H, dx:dx + W] for dy in range(3) for dx in range(3)]
    xcol = jnp.stack(taps, axis=1).reshape(B, 9 * C, HW).astype(jnp.bfloat16)

    # (Cout=C, Cin, kh, kw) -> (C, kh, kw, Cin) -> (C, 9*Cin), matching xcol rows.
    w1r = jnp.transpose(w1, (0, 2, 3, 1)).reshape(C, 9 * C).astype(jnp.bfloat16)
    w2r = w2.reshape(Cout, C).astype(jnp.bfloat16)

    flops = 2 * B * HW * (9 * C * C + C * Cout)
    bytes_accessed = (B * 9 * C * HW * 2 + C * 9 * C * 2 + Cout * C * 2
                      + (2 * C + Cout) * 4 + B * Cout * HW * 4)

    out = pl.pallas_call(
        _head_kernel,
        out_shape=jax.ShapeDtypeStruct((B, Cout, HW), jnp.float32),
        grid_spec=pltpu.PrefetchScalarGridSpec(
            num_scalar_prefetch=0,
            grid=(B,),
            in_specs=[
                pl.BlockSpec((1, 9 * C, HW), lambda i: (i, 0, 0)),
                pl.BlockSpec((C, 9 * C), lambda i: (0, 0)),
                pl.BlockSpec((C, 1), lambda i: (0, 0)),
                pl.BlockSpec((C, 1), lambda i: (0, 0)),
                pl.BlockSpec((Cout, C), lambda i: (0, 0)),
                pl.BlockSpec((Cout, 1), lambda i: (0, 0)),
            ],
            out_specs=pl.BlockSpec((1, Cout, HW), lambda i: (i, 0, 0)),
        ),
        compiler_params=pltpu.CompilerParams(
            dimension_semantics=("parallel",)),
        cost_estimate=pl.CostEstimate(flops=flops, transcendentals=0,
                                      bytes_accessed=bytes_accessed),
    )(xcol, w1r, scale[:, None], shift[:, None], w2r, b2[:, None])

    return out.reshape(B, Cout, H, W)


def _reference_head(x, w1, b1, gamma, beta, run_mean, run_var, w2, b2, eps=1e-5):
    conv1 = jax.lax.conv_general_dilated(
        x, w1, window_strides=(1, 1), padding=((1, 1), (1, 1)),
        dimension_numbers=("NCHW", "OIHW", "NCHW")) + b1[None, :, None, None]
    bn = ((conv1 - run_mean[None, :, None, None])
          / jnp.sqrt(run_var[None, :, None, None] + eps)
          * gamma[None, :, None, None] + beta[None, :, None, None])
    act = jnp.maximum(bn, 0.0)
    out = jax.lax.conv_general_dilated(
        act, w2, window_strides=(1, 1), padding=((0, 0), (0, 0)),
        dimension_numbers=("NCHW", "OIHW", "NCHW"))
    return out + b2[None, :, None, None]


if __name__ == "__main__":
    # Config implied by the module: use_map=False, use_vis=False -> channel=32,
    # binary -> category_num=2, anchor_num_per_loc=2, box_code_size=6,
    # only_det -> out_seq_len=1.  Small spatial size for the self-test.
    B, C, H, W = 2, 32, 16, 16
    category_num, anchor_num, box_code_size, out_seq_len = 2, 2, 6, 1
    C_CLS = category_num * anchor_num                      # ClassificationHead out
    C_LOC = anchor_num * box_code_size * out_seq_len       # SingleRegressionHead out

    key = jax.random.PRNGKey(0)
    ks = jax.random.split(key, 16)
    x = jax.random.normal(ks[0], (B, C, H, W), jnp.float32)

    def make_head(keys, cout):
        w1 = jax.random.normal(keys[0], (C, C, 3, 3), jnp.float32) * 0.05
        b1 = jax.random.normal(keys[1], (C,), jnp.float32) * 0.1
        gamma = 1.0 + 0.1 * jax.random.normal(keys[2], (C,), jnp.float32)
        beta = 0.1 * jax.random.normal(keys[3], (C,), jnp.float32)
        mean = 0.1 * jax.random.normal(keys[4], (C,), jnp.float32)
        var = jnp.abs(1.0 + 0.1 * jax.random.normal(keys[5], (C,), jnp.float32))
        w2 = jax.random.normal(keys[6], (cout, C, 1, 1), jnp.float32) * 0.05
        b2 = 0.1 * jnp.arange(cout, dtype=jnp.float32)
        return (w1, b1, gamma, beta, mean, var, w2, b2)

    cls_params = make_head(ks[1:8], C_CLS)
    loc_params = make_head(ks[8:15], C_LOC)

    cls_preds = fused_head(x, *cls_params)     # ClassificationHead
    loc_preds = fused_head(x, *loc_params)     # SingleRegressionHead
    cls_preds, loc_preds = jax.block_until_ready((cls_preds, loc_preds))

    cls_ref = _reference_head(x, *cls_params)
    loc_ref = _reference_head(x, *loc_params)

    assert cls_preds.shape == (B, C_CLS, H, W)
    assert loc_preds.shape == (B, C_LOC, H, W)
    # bf16 MXU operands with f32 accumulation -> looser tolerance than pure f32.
    assert jnp.allclose(cls_preds, cls_ref, atol=3e-2, rtol=3e-2)
    assert jnp.allclose(loc_preds, loc_ref, atol=3e-2, rtol=3e-2)

    # Mirror the model forward's output packaging (pure reshapes).
    cls_out = jnp.transpose(cls_preds, (0, 2, 3, 1)).reshape(B, -1, category_num)
    loc_out = jnp.transpose(loc_preds, (0, 2, 3, 1)).reshape(
        -1, H, W, anchor_num, out_seq_len, box_code_size)
    assert cls_out.shape == (B, H * W * anchor_num, category_num)
    assert loc_out.shape == (B, H, W, anchor_num, out_seq_len, box_code_size)

    print("KERNEL_OK")
</pallas_src>

<mosaic_0001>
module attributes {stable_mosaic.version = 11 : i64} {
  func.func @_head_kernel(%arg0: i32, %arg1: memref<1x288x256xbf16, #tpu.memory_space<vmem>>, %arg2: memref<32x288xbf16, #tpu.memory_space<vmem>>, %arg3: memref<32x1xf32, #tpu.memory_space<vmem>>, %arg4: memref<32x1xf32, #tpu.memory_space<vmem>>, %arg5: memref<4x32xbf16, #tpu.memory_space<vmem>>, %arg6: memref<4x1xf32, #tpu.memory_space<vmem>>, %arg7: memref<1x4x256xf32, #tpu.memory_space<vmem>>) attributes {dimension_semantics = [#tpu.dimension_semantics<parallel>], iteration_bounds = array<i64: 2>, scalar_prefetch = 0 : i64, scratch_operands = 0 : i64, tpu.core_type = #tpu.core_type<tc>, window_params = [{transform_indices = @transform_0, window_bounds = array<i64: 1, 288, 256>}, {pipeline_mode = #tpu.pipeline_mode<synchronous>, transform_indices = @transform_1, window_bounds = array<i64: 32, 288>}, {pipeline_mode = #tpu.pipeline_mode<synchronous>, transform_indices = @transform_2, window_bounds = array<i64: 32, 1>}, {pipeline_mode = #tpu.pipeline_mode<synchronous>, transform_indices = @transform_3, window_bounds = array<i64: 32, 1>}, {pipeline_mode = #tpu.pipeline_mode<synchronous>, transform_indices = @transform_4, window_bounds = array<i64: 4, 32>}, {pipeline_mode = #tpu.pipeline_mode<synchronous>, transform_indices = @transform_5, window_bounds = array<i64: 4, 1>}, {transform_indices = @transform_6, window_bounds = array<i64: 1, 4, 256>}]} {
    %c0 = arith.constant 0 : index
    %c0_0 = arith.constant 0 : index
    %0 = vector.load %arg2[%c0, %c0_0] : memref<32x288xbf16, #tpu.memory_space<vmem>>, vector<32x288xbf16>
    %c0_1 = arith.constant 0 : index
    %c0_2 = arith.constant 0 : index
    %c0_3 = arith.constant 0 : index
    %1 = vector.load %arg1[%c0_1, %c0_2, %c0_3] : memref<1x288x256xbf16, #tpu.memory_space<vmem>>, vector<1x288x256xbf16>
    %2 = vector.shape_cast %1 : vector<1x288x256xbf16> to vector<288x256xbf16>
    %cst = arith.constant dense<0.000000e+00> : vector<32x256xf32>
    %3 = tpu.matmul %0, %2, %cst {dimension_numbers = #tpu.dot_dimension_numbers<[1], [0], [0], [1], [0, 0, 1, 1], [], []>} : vector<32x288xbf16>, vector<288x256xbf16>, vector<32x256xf32> -> vector<32x256xf32>
    %c0_4 = arith.constant 0 : index
    %c0_5 = arith.constant 0 : index
    %4 = vector.load %arg3[%c0_4, %c0_5] : memref<32x1xf32, #tpu.memory_space<vmem>>, vector<32x1xf32>
    %5 = vector.broadcast %4 : vector<32x1xf32> to vector<32x256xf32>
    %6 = arith.mulf %3, %5 : vector<32x256xf32>
    %c0_6 = arith.constant 0 : index
    %c0_7 = arith.constant 0 : index
    %7 = vector.load %arg4[%c0_6, %c0_7] : memref<32x1xf32, #tpu.memory_space<vmem>>, vector<32x1xf32>
    %8 = vector.broadcast %7 : vector<32x1xf32> to vector<32x256xf32>
    %9 = arith.addf %6, %8 : vector<32x256xf32>
    %cst_8 = arith.constant 0.000000e+00 : f32
    %10 = vector.broadcast %cst_8 : f32 to vector<32x256xf32>
    %11 = arith.maximumf %9, %10 : vector<32x256xf32>
    %c0_9 = arith.constant 0 : index
    %c0_10 = arith.constant 0 : index
    %12 = vector.load %arg5[%c0_9, %c0_10] : memref<4x32xbf16, #tpu.memory_space<vmem>>, vector<4x32xbf16>
    %13 = arith.truncf %11 : vector<32x256xf32> to vector<32x256xbf16>
    %cst_11 = arith.constant dense<0.000000e+00> : vector<4x256xf32>
    %14 = tpu.matmul %12, %13, %cst_11 {dimension_numbers = #tpu.dot_dimension_numbers<[1], [0], [0], [1], [0, 0, 1, 1], [], []>} : vector<4x32xbf16>, vector<32x256xbf16>, vector<4x256xf32> -> vector<4x256xf32>
    %c0_12 = arith.constant 0 : index
    %c0_13 = arith.constant 0 : index
    %15 = vector.load %arg6[%c0_12, %c0_13] : memref<4x1xf32, #tpu.memory_space<vmem>>, vector<4x1xf32>
    %16 = vector.broadcast %15 : vector<4x1xf32> to vector<4x256xf32>
    %17 = arith.addf %14, %16 : vector<4x256xf32>
    %18 = vector.shape_cast %17 : vector<4x256xf32> to vector<1x4x256xf32>
    %c0_14 = arith.constant 0 : index
    %c0_15 = arith.constant 0 : index
    %c0_16 = arith.constant 0 : index
    %19 = vector.load %arg7[%c0_14, %c0_15, %c0_16] : memref<1x4x256xf32, #tpu.memory_space<vmem>>, vector<1x4x256xf32>
    tpu.vector_store %arg7[%c0_14, %c0_15, %c0_16], %18 {strides = array<i32>} : memref<1x4x256xf32, #tpu.memory_space<vmem>>, vector<1x4x256xf32>,
    return
  }
  func.func @transform_0(%arg0: i32) -> (i32, i32, i32) {
    %c0_i32 = arith.constant 0 : i32
    %c0_i32_0 = arith.constant 0 : i32
    %c0_i32_1 = arith.constant 0 : i32
    return %arg0, %c0_i32, %c0_i32_0 : i32, i32, i32
  }
  func.func @transform_1(%arg0: i32) -> (i32, i32) {
    %c0_i32 = arith.constant 0 : i32
    %c0_i32_0 = arith.constant 0 : i32
    %c0_i32_1 = arith.constant 0 : i32
    return %c0_i32, %c0_i32_0 : i32, i32
  }
  func.func @transform_2(%arg0: i32) -> (i32, i32) {
    %c0_i32 = arith.constant 0 : i32
    %c0_i32_0 = arith.constant 0 : i32
    %c0_i32_1 = arith.constant 0 : i32
    return %c0_i32, %c0_i32_0 : i32, i32
  }
  func.func @transform_3(%arg0: i32) -> (i32, i32) {
    %c0_i32 = arith.constant 0 : i32
    %c0_i32_0 = arith.constant 0 : i32
    %c0_i32_1 = arith.constant 0 : i32
    return %c0_i32, %c0_i32_0 : i32, i32
  }
  func.func @transform_4(%arg0: i32) -> (i32, i32) {
    %c0_i32 = arith.constant 0 : i32
    %c0_i32_0 = arith.constant 0 : i32
    %c0_i32_1 = arith.constant 0 : i32
    return %c0_i32, %c0_i32_0 : i32, i32
  }
  func.func @transform_5(%arg0: i32) -> (i32, i32) {
    %c0_i32 = arith.constant 0 : i32
    %c0_i32_0 = arith.constant 0 : i32
    %c0_i32_1 = arith.constant 0 : i32
    return %c0_i32, %c0_i32_0 : i32, i32
  }
  func.func @transform_6(%arg0: i32) -> (i32, i32, i32) {
    %c0_i32 = arith.constant 0 : i32
    %c0_i32_0 = arith.constant 0 : i32
    %c0_i32_1 = arith.constant 0 : i32
    return %arg0, %c0_i32, %c0_i32_0 : i32, i32, i32
  }
}

</mosaic_0001>

<bundles_post_ra>
// kernel: fused_head.1
= control target key start
LH: loop header
LB: loop body
LE: loop exit
PB: predicated region body
PF: predicated region fallthrough
CT: control target
= control target key end

     0   :  { %s1088_s21 = smov 0   ;;  %s1267_s0 = inlined_call_operand.vmem [shape: bf16[2,288,256], index: 0, kind: input, shape index: {}]   ;;  %s1268_s1 = inlined_call_operand.vmem [shape: bf16[32,288], index: 1, kind: input, shape index: {}]   ;;  %s1269_s2 = inlined_call_operand.vmem [shape: f32[32,1], index: 2, kind: input, shape index: {}]   ;;  %s1270_s3 = inlined_call_operand.vmem [shape: f32[32,1], index: 3, kind: input, shape index: {}]   ;;  %s1271_s4 = inlined_call_operand.vmem [shape: bf16[4,32], index: 4, kind: input, shape index: {}]   ;;  %s1272_s5 = inlined_call_operand.vmem [shape: f32[4,1], index: 5, kind: input, shape index: {}]   ;;  %s1273_s6 = inlined_call_operand.vmem [shape: f32[2,4,256], index: 6, kind: output, shape index: {}]  }
   0x1 LB: > { %s802_s22 = sadd.s32 4294967295, %s1050_s21   ;;  %p806_p0 = scmp.ge.s32.totalorder %s1050_s21, 1  ;;  %s1050_s21 = sphi %s1088_s21, %s16_s21  }
   0x2   : > { %p212_p1 = scmp.lt.s32.totalorder %s1050_s21, 3 }
   0x4   : > { %p213_p2 = pnand %p806_p0, %p212_p1 }
   0x5   : > { %p242_p3 = scmp.lt.s32.totalorder (!%p213_p2), %s802_s22, 1 }
   0x6   : > { %216 = sbr.rel (%p213_p2) target bundleno = 388 (0x184), region = 44 }
   0xb   : > { %s1275_s22 = smov (!%p242_p3, %s802_s22), 1  ;;  %v820_v12 = vld [vmem:[%s1268_s1 + $0x8] sm:$0xf]  ;;  %v989_v13 = vld [vmem:[%s1268_s1 + $0x10] sm:$0xf0]  ;;  %vm507_vm0 = vcmask 261120  }
   0xc   : > { %s1031_s23 = smul.u32 288, %s1275_s22  ;;  %v1130_v29 = vor.u32 %v989_v13, %v820_v12  ;;  %v630_v13 = vld [vmem:[%s1269_s2 + $0x10] sm:$0xff]  ;;  %s986_s28 = sshll.u32 %s1275_s22, 3  ;;  %vm743_vm1 = vcmask 1043456  }
   0xd   : > { %s251_s7 = scalar_lea.vmem %s1273_s6, %s986_s28 }
   0xe   : > { %s1102_s26 = scalar_lea.vmem %s1267_s0, %s1031_s23 }
   0xf   : > { %v892_v0 = vld [vmem:[%s1102_s26 + $0x70] sm:$0xf]  ;;  %v1008_v1 = vld [vmem:[%s1102_s26 + $0x74] sm:$0xf0]  ;;  %v884_v9 = vld [vmem:[%s1102_s26 + $0x60] sm:$0xf] }
  0x10   : > { %v956_v2 = vld [vmem:[%s1102_s26 + $0xf0] sm:$0xf]  ;;  %v893_v3 = vor.u32 %v1008_v1, %v892_v0  ;;  %v1024_v4 = vld [vmem:[%s1102_s26 + $0xf4] sm:$0xf0]  ;;  %v1006_v10 = vld [vmem:[%s1102_s26 + $0x64] sm:$0xf0] }
  0x11   : > { %v972_v5 = vld [vmem:[%s1102_s26 + $0x110] sm:$0xf]  ;;  %v1028_v6 = vld [vmem:[%s1102_s26 + $0x114] sm:$0xf0]  ;;  %v957_v7 = vor.u32 %v1024_v4, %v956_v2  ;;  %v948_v11 = vld [vmem:[%s1102_s26 + $0xe0] sm:$0xf]  ;;  %v885_v14 = vor.u32 %v1006_v10, %v884_v9 }
  0x12   : > { %v973_v8 = vor.u32 %v1028_v6, %v972_v5  ;;  %514 = vmatpush.bf16.msra.mxu0 %v893_v3  ;;  %v1022_v15 = vld [vmem:[%s1102_s26 + $0xe4] sm:$0xf0]  ;;  %v964_v16 = vld [vmem:[%s1102_s26 + $0x100] sm:$0xf]  ;;  %v876_v20 = vld [vmem:[%s1102_s26 + $0x50] sm:$0xf] }
  0x13   : > { %v1026_v17 = vld [vmem:[%s1102_s26 + $0x104] sm:$0xf0]  ;;  %533 = vmatpush.bf16.msra.mxu1 %v957_v7  ;;  %v949_v18 = vor.u32 %v1022_v15, %v948_v11  ;;  %v1004_v21 = vld [vmem:[%s1102_s26 + $0x54] sm:$0xf0]  ;;  %v940_v22 = vld [vmem:[%s1102_s26 + $0xd0] sm:$0xf] }
  0x14   : > { %558 = vmatpush.bf16.msra.mxu2 %v973_v8  ;;  %v965_v19 = vor.u32 %v1026_v17, %v964_v16  ;;  %v1020_v23 = vld [vmem:[%s1102_s26 + $0xd4] sm:$0xf0]  ;;  %v1007_v24 = vld [vmem:[%s1102_s26 + $0x74] sm:$0xf]  ;;  %v894_v25 = vld [vmem:[%s1102_s26 + $0x78] sm:$0xf0]  ;;  %v877_v30 = vor.u32 %v1004_v21, %v876_v20 }
  0x15   : > { %v897_v26 = vor.u32 %v1007_v24, %v894_v25  ;;  %v1023_v27 = vld [vmem:[%s1102_s26 + $0xf4] sm:$0xf]  ;;  %v958_v28 = vld [vmem:[%s1102_s26 + $0xf8] sm:$0xf0]  ;;  %v868_v32 = vld [vmem:[%s1102_s26 + $0x40] sm:$0xf]  ;;  %v941_v34 = vor.u32 %v1020_v23, %v940_v22 }
  0x16   : > { %515 = vmatpush.bf16.msra.mxu0 %v885_v14  ;;  %v961_v31 = vor.u32 %v1023_v27, %v958_v28  ;;  %v1002_v33 = vld [vmem:[%s1102_s26 + $0x44] sm:$0xf0]  ;;  %v1005_v35 = vld [vmem:[%s1102_s26 + $0x64] sm:$0xf]  ;;  %v886_v36 = vld [vmem:[%s1102_s26 + $0x68] sm:$0xf0] }
  0x17   : > { %534 = vmatpush.bf16.msra.mxu1 %v949_v18  ;;  %v1021_v37 = vld [vmem:[%s1102_s26 + $0xe4] sm:$0xf]  ;;  %571 = vmatpush.bf16.msra.mxu3 %v897_v26  ;;  %v932_v38 = vld [vmem:[%s1102_s26 + $0xc0] sm:$0xf]  ;;  %v1018_v39 = vld [vmem:[%s1102_s26 + $0xc4] sm:$0xf0]  ;;  %v889_v40 = vor.u32 %v1005_v35, %v886_v36  ;;  %v869_v44 = vor.u32 %v1002_v33, %v868_v32 }
  0x18   : > { %559 = vmatpush.bf16.msra.mxu2 %v965_v19  ;;  %v950_v41 = vld [vmem:[%s1102_s26 + $0xe8] sm:$0xf0]  ;;  %v1003_v43 = vld [vmem:[%s1102_s26 + $0x54] sm:$0xf]  ;;  %v878_v45 = vld [vmem:[%s1102_s26 + $0x58] sm:$0xf0]  ;;  %v933_v48 = vor.u32 %v1018_v39, %v932_v38 }
  0x19   : > { %v953_v42 = vor.u32 %v1021_v37, %v950_v41  ;;  %v1019_v46 = vld [vmem:[%s1102_s26 + $0xd4] sm:$0xf]  ;;  %v942_v47 = vld [vmem:[%s1102_s26 + $0xd8] sm:$0xf0]  ;;  %v860_v49 = vld [vmem:[%s1102_s26 + $0x30] sm:$0xf]  ;;  %v881_v53 = vor.u32 %v1003_v43, %v878_v45 }
  0x1a   : > { %516 = vmatpush.bf16.msra.mxu0 %v877_v30  ;;  %v1000_v50 = vld [vmem:[%s1102_s26 + $0x34] sm:$0xf0]  ;;  %v924_v51 = vld [vmem:[%s1102_s26 + $0xb0] sm:$0xf]  ;;  %v945_v54 = vor.u32 %v1019_v46, %v942_v47  ;;  %v1001_v55 = vld [vmem:[%s1102_s26 + $0x44] sm:$0xf] }
  0x1b   : > { %978 = vmatmul.msk.bf16.vlgmr.msra.gmra.mxu2 %vm507_vm0, %v1130_v29  ;;  %535 = vmatpush.bf16.msra.mxu1 %v941_v34  ;;  %v1016_v52 = vld [vmem:[%s1102_s26 + $0xb4] sm:$0xf0]  ;;  %v870_v56 = vld [vmem:[%s1102_s26 + $0x48] sm:$0xf0]  ;;  %v1017_v57 = vld [vmem:[%s1102_s26 + $0xc4] sm:$0xf]  ;;  %v861_v59 = vor.u32 %v1000_v50, %v860_v49 }
  0x1c   : > { %590 = vmatpush.bf16.msrb.mxu2 %v961_v31  ;;  %572 = vmatpush.bf16.msra.mxu3 %v889_v40  ;;  %v934_v58 = vld [vmem:[%s1102_s26 + $0xc8] sm:$0xf0]  ;;  %v925_v60 = vor.u32 %v1016_v52, %v924_v51  ;;  %v852_v61 = vld [vmem:[%s1102_s26 + $0x20] sm:$0xf]  ;;  %v998_v62 = vld [vmem:[%s1102_s26 + $0x24] sm:$0xf0]  ;;  %v873_v1 = vor.u32 %v1001_v55, %v870_v56 }
  0x1d   : > { %v916_v63 = vld [vmem:[%s1102_s26 + $0xa0] sm:$0xf]  ;;  %v1014_v0 = vld [vmem:[%s1102_s26 + $0xa4] sm:$0xf0]  ;;  %v937_v2 = vor.u32 %v1017_v57, %v934_v58  ;;  %v999_v3 = vld [vmem:[%s1102_s26 + $0x34] sm:$0xf]  ;;  %v853_v7 = vor.u32 %v998_v62, %v852_v61 }
  0x1e   : > { %517 = vmatpush.bf16.msra.mxu0 %v869_v44  ;;  %v862_v4 = vld [vmem:[%s1102_s26 + $0x38] sm:$0xf0]  ;;  %v1015_v5 = vld [vmem:[%s1102_s26 + $0xb4] sm:$0xf]  ;;  %v832_v8 = vld [vmem:[%s1268_s1 + $0x20] sm:$0xf]  ;;  %v917_v10 = vor.u32 %v1014_v0, %v916_v63 }
  0x1f   : > { %536 = vmatpush.bf16.msra.mxu1 %v933_v48  ;;  %v926_v6 = vld [vmem:[%s1102_s26 + $0xb8] sm:$0xf0]  ;;  %v992_v9 = vld [vmem:[%s1268_s1 + $0x28] sm:$0xf0]  ;;  %v844_v11 = vld [vmem:[%s1102_s26 + $0x10] sm:$0xf]  ;;  %v865_v16 = vor.u32 %v999_v3, %v862_v4 }
  0x20   : > { %591 = vmatpush.bf16.msrb.mxu2 %v953_v42  ;;  %573 = vmatpush.bf16.msra.mxu3 %v881_v53  ;;  %v996_v12 = vld [vmem:[%s1102_s26 + $0x14] sm:$0xf0]  ;;  %v908_v14 = vld [vmem:[%s1102_s26 + $0x90] sm:$0xf]  ;;  %v929_v17 = vor.u32 %v1015_v5, %v926_v6  ;;  %v997_v18 = vld [vmem:[%s1102_s26 + $0x24] sm:$0xf]  ;;  %v1179_v23 = vor.u32 %v992_v9, %v832_v8 }
  0x21   : > { %v1012_v15 = vld [vmem:[%s1102_s26 + $0x94] sm:$0xf0]  ;;  %v854_v19 = vld [vmem:[%s1102_s26 + $0x28] sm:$0xf0]  ;;  %v1013_v20 = vld [vmem:[%s1102_s26 + $0xa4] sm:$0xf]  ;;  %v845_v24 = vor.u32 %v996_v12, %v844_v11 }
  0x22   : > { %518 = vmatpush.bf16.msra.mxu0 %v861_v59  ;;  %v918_v21 = vld [vmem:[%s1102_s26 + $0xa8] sm:$0xf0]  ;;  %v1052_v22 = vmov 0   ;;  %v836_v25 = vld [vmem:[%s1102_s26] sm:$0xf]  ;;  %v909_v26 = vor.u32 %v1012_v15, %v908_v14  ;;  %v662_v30 = vld [vmem:[%s1270_s3 + $0x10] sm:$0xff]  ;;  %v857_v32 = vor.u32 %v997_v18, %v854_v19 }
  0x23   : > { %537 = vmatpush.bf16.msra.mxu1 %v925_v60  ;;  %1041 = vset.pattern.permute.xlu0 %v1052_v22  ;;  %v994_v27 = vld [vmem:[%s1102_s26 + $0x4] sm:$0xf0]  ;;  %v900_v28 = vld [vmem:[%s1102_s26 + $0x80] sm:$0xf]  ;;  %v921_v33 = vor.u32 %v1013_v20, %v918_v21  ;;  %v995_v35 = vld [vmem:[%s1102_s26 + $0x14] sm:$0xf] }
  0x24   : > { %592 = vmatpush.bf16.msrb.mxu2 %v945_v54  ;;  %574 = vmatpush.bf16.msra.mxu3 %v873_v1  ;;  %v1010_v31 = vld [vmem:[%s1102_s26 + $0x84] sm:$0xf0]  ;;  %v812_v34 = vld [vmem:[%s1268_s1] sm:$0xf]  ;;  %v846_v36 = vld [vmem:[%s1102_s26 + $0x18] sm:$0xf0]  ;;  %v837_v39 = vor.u32 %v994_v27, %v836_v25 }
  0x25   : > { %1042 = vset.pattern.permute.xlu1 %v1052_v22  ;;  %644 = vperm.xlu0 %1041, %v630_v13   ;;  %v1011_v37 = vld [vmem:[%s1102_s26 + $0x94] sm:$0xf]  ;;  %v910_v38 = vld [vmem:[%s1102_s26 + $0x98] sm:$0xf0]  ;;  %v988_v40 = vld [vmem:[%s1268_s1 + $0x8] sm:$0xf0]  ;;  %v901_v43 = vor.u32 %v1010_v31, %v900_v28  ;;  %v849_v48 = vor.u32 %v995_v35, %v846_v36 }
  0x26   : > { %519 = vmatpush.bf16.msra.mxu0 %v853_v7  ;;  %1043 = vset.pattern.permute.xlu2 %v1052_v22  ;;  %v1027_v41 = vld [vmem:[%s1102_s26 + $0x114] sm:$0xf]  ;;  %v974_v42 = vld [vmem:[%s1102_s26 + $0x118] sm:$0xf0]  ;;  %v987_v44 = vld [vmem:[%s1268_s1 + $0x4] sm:$0xf]  ;;  %v913_v49 = vor.u32 %v1011_v37, %v910_v38  ;;  %v813_v53 = vor.u32 %v988_v40, %v812_v34 }
  0x27   : > { %538 = vmatpush.bf16.msra.mxu1 %v917_v10  ;;  %676 = vperm.xlu1 %1042, %v662_v30   ;;  %v814_v45 = vld [vmem:[%s1268_s1 + $0xc] sm:$0xf0]  ;;  %v631_v46 = vld [vmem:[%s1269_s2 + $0x18] sm:$0xff]  ;;  %v977_v47 = vor.u32 %v1027_v41, %v974_v42  ;;  %v993_v50 = vld [vmem:[%s1102_s26 + $0x4] sm:$0xf] }
  0x28   : > { %593 = vmatpush.bf16.msrb.mxu2 %v937_v2  ;;  %575 = vmatpush.bf16.msra.mxu3 %v865_v16  ;;  %v1025_v51 = vld [vmem:[%s1102_s26 + $0x104] sm:$0xf]  ;;  %v966_v52 = vld [vmem:[%s1102_s26 + $0x108] sm:$0xf0]  ;;  %v817_v57 = vor.u32 %v987_v44, %v814_v45  ;;  %v663_v58 = vld [vmem:[%s1270_s3 + $0x18] sm:$0xff] }
  0x29   : > { %v838_v54 = vld [vmem:[%s1102_s26 + $0x8] sm:$0xf0]  ;;  %v1009_v55 = vld [vmem:[%s1102_s26 + $0x84] sm:$0xf]  ;;  %v969_v59 = vor.u32 %v1025_v51, %v966_v52  ;;  %v824_v1 = vld [vmem:[%s1268_s1 + $0x18] sm:$0xf] }
  0x2a   : > { %520 = vmatpush.bf16.msra.mxu0 %v845_v24  ;;  %v902_v56 = vld [vmem:[%s1102_s26 + $0x88] sm:$0xf0]  ;;  %v841_v60 = vor.u32 %v993_v50, %v838_v54  ;;  %v628_v62 = vld [vmem:[%s1269_s2] sm:$0xff]  ;;  %v990_v4 = vld [vmem:[%s1268_s1 + $0x1c] sm:$0xf] }
  0x2b   : > { %979 = vmatmul.msk.bf16.gmra.mxu2 %vm507_vm0, %v1179_v23  ;;  %539 = vmatpush.bf16.msra.mxu1 %v909_v26  ;;  %v905_v61 = vor.u32 %v1009_v55, %v902_v56  ;;  %v660_v63 = vld [vmem:[%s1270_s3] sm:$0xff]  ;;  %v661_v0 = vld [vmem:[%s1270_s3 + $0x8] sm:$0xff] }
  0x2c   : > { %594 = vmatpush.bf16.msrb.mxu2 %v929_v17  ;;  %576 = vmatpush.bf16.msra.mxu3 %v857_v32  ;;  %v991_v2 = vld [vmem:[%s1268_s1 + $0x20] sm:$0xf0]  ;;  %v629_v3 = vld [vmem:[%s1269_s2 + $0x8] sm:$0xff]  ;;  %v705_v8 = vld [vmem:[%s1272_s5] sm:$0xf] }
  0x2d   : > { %649 = vperm.xlu0 %1041, %v631_v46   ;;  %634 = vperm.xlu2 %1043, %v628_v62   ;;  %v826_v5 = vld [vmem:[%s1268_s1 + $0x24] sm:$0xf0]  ;;  %v825_v6 = vor.u32 %v991_v2, %v824_v1 }
  0x2e   : > { %521 = vmatpush.bf16.msra.mxu0 %v837_v39  ;;  %v829_v7 = vor.u32 %v990_v4, %v826_v5 }
  0x2f   : > { %540 = vmatpush.bf16.msra.mxu1 %v901_v43  ;;  %681 = vperm.xlu1 %1042, %v663_v58  }
  0x30   : > { %595 = vmatpush.bf16.msrb.mxu2 %v921_v33  ;;  %577 = vmatpush.bf16.msra.mxu3 %v849_v48 }
  0x31   : > { %522 = vmatmul.bf16.vlgmr.msra.gmra.mxu0 %v813_v53 }
  0x32   : > { %615 = vmatpush.bf16.msrb.mxu0 %v977_v47  ;;  %541 = vmatmul.bf16.vlgmr.msra.gmra.mxu1 %v817_v57 }
  0x34   : > { %596 = vmatpush.bf16.msrb.mxu2 %v913_v49  ;;  %578 = vmatpush.bf16.msra.mxu3 %v841_v60 }
  0x35   : > { %666 = vperm.xlu0 %1041, %v660_v63   ;;  %639 = vperm.xlu2 %1043, %v629_v3  }
  0x36   : > { %616 = vmatpush.bf16.msrb.mxu0 %v969_v59 }
  0x37   : > { %579 = vmatmul.bf16.vlgmr.msra.gmra.mxu3 %v813_v53  ;;  %671 = vperm.xlu1 %1042, %v661_v0  }
  0x38   : > { %597 = vmatpush.bf16.msrb.mxu2 %v905_v61 }
  0x3b   : > { %598 = vmatmul.bf16.vlgmr.msrb.gmra.mxu2 %v817_v57 }
  0x3c   : > { %1029 = vmatpush.bf16.msra.mxu2 %v977_v47 }
  0x3d   : > { %708 = vperm.xlu2 %1043, %v705_v8  }
  0x40   : > { %1030 = vmatpush.bf16.msra.mxu2 %v969_v59  ;;  %v700_v59 = vld [vmem:[%s1271_s4] sm:$0x3] }
  0x41   : > { %527 = vmatmul.bf16.gmra.mxu0 %v825_v6 }
  0x42   : > { %546 = vmatmul.bf16.gmra.mxu1 %v829_v7 }
  0x47   : > { %584 = vmatmul.bf16.gmra.mxu3 %v825_v6 }
  0x4b   : > { %603 = vmatmul.bf16.gmra.mxu2 %v829_v7 }
  0x51   : > { %980 = vmatmul.msk.bf16.vlgmr.msrb.gmra.mxu0 %vm507_vm0, %v1130_v29 }
  0x5b   : > { %981 = vmatmul.msk.bf16.vlgmr.msra.gmra.mxu2 %vm507_vm0, %v1179_v23 }
  0x87   : > { %v635_v19 = vpop.permute.xlu2 %634 }
  0x8f   : > { %v640_v33 = vpop.permute.xlu2 %639 }
  0x97   : > { %v645_v18 = vpop.permute.xlu0 %644 }
  0x99   : > { %v1251_v16 = vpop.permute.xlu1 %676 }
  0x9e   : > { %v561_v9 = vpop.f32.mrf.mxu2 }
  0x9f   : > { %v650_v25 = vpop.permute.xlu0 %649 }
  0xa1   : > { %v682_v29 = vpop.permute.xlu1 %681 }
  0xa6   : > { %v563_v10 = vpop.f32.mrf.mxu2 }
  0xa7   : > { %v667_v42 = vpop.permute.xlu0 %666 }
  0xa9   : > { %v672_v40 = vpop.permute.xlu1 %671 }
  0xae   : > { %v566_v11 = vpop.f32.mrf.mxu2  ;;  %v523_v12 = vpop.f32.mrf.mxu0 }
  0xaf   : > { %v542_v13 = vpop.f32.mrf.mxu1 }
  0xb0   : > { %v543_v27 = vadd.f32 %v542_v13, %v523_v12 }
  0xb2   : > { %v562_v35 = vadd.f32 %v561_v9, %v543_v27 }
  0xb4   : > { %v652_v41 = vmul.f32 %v635_v19, %v562_v35 }
  0xb6   : > { %v568_v14 = vpop.f32.mrf.mxu2  ;;  %v525_v15 = vpop.f32.mrf.mxu0  ;;  %v684_v49 = vadd.f32 %v667_v42, %v652_v41 }
  0xb7   : > { %v544_v17 = vpop.f32.mrf.mxu1 }
  0xb8   : > { %v545_v26 = vadd.f32 %v544_v17, %v525_v15  ;;  %v692_v54 = vmax.f32 %v684_v49, 0.0 }
  0xba   : > { %v580_v23 = vpop.f32.mrf.mxu3  ;;  %v564_v31 = vadd.f32 %v563_v10, %v545_v26 }
  0xbc   : > { %v654_v38 = vmul.f32 %v640_v33, %v564_v31 }
  0xbe   : > { %v599_v20 = vpop.f32.mrf.mxu2  ;;  %v528_v21 = vpop.f32.mrf.mxu0  ;;  %v686_v47 = vadd.f32 %v672_v40, %v654_v38 }
  0xbf   : > { %v547_v22 = vpop.f32.mrf.mxu1  ;;  %v600_v2 = vadd.f32 %v599_v20, %v580_v23 }
  0xc0   : > { %v548_v24 = vadd.f32 %v547_v22, %v528_v21  ;;  %v694_v52 = vmax.f32 %v686_v47, 0.0 }
  0xc2   : > { %v567_v28 = vadd.f32 %v566_v11, %v548_v24  ;;  %v582_v45 = vpop.f32.mrf.mxu3  ;;  %v701_v57 = vpack.c.bf16 %v694_v52, %v692_v54 }
  0xc4   : > { %v656_v36 = vmul.f32 %v645_v18, %v567_v28 }
  0xc6   : > { %v601_v30 = vpop.f32.mrf.mxu2  ;;  %v530_v32 = vpop.f32.mrf.mxu0  ;;  %v688_v44 = vadd.f32 %v1251_v16, %v656_v36 }
  0xc7   : > { %v549_v34 = vpop.f32.mrf.mxu1  ;;  %v602_v63 = vadd.f32 %v601_v30, %v582_v45 }
  0xc8   : > { %v550_v37 = vadd.f32 %v549_v34, %v530_v32  ;;  %v696_v50 = vmax.f32 %v688_v44, 0.0 }
  0xca   : > { %v569_v39 = vadd.f32 %v568_v14, %v550_v37  ;;  %v585_v58 = vpop.f32.mrf.mxu3 }
  0xcc   : > { %v658_v43 = vmul.f32 %v650_v25, %v569_v39 }
  0xce   : > { %v604_v46 = vpop.f32.mrf.mxu2  ;;  %v690_v48 = vadd.f32 %v682_v29, %v658_v43  ;;  %v618_v55 = vpop.f32.mrf.mxu0 }
  0xcf   : > { %v605_v61 = vadd.f32 %v604_v46, %v585_v58  ;;  %v619_v4 = vadd.f32 %v618_v55, %v600_v2 }
  0xd0   : > { %v698_v51 = vmax.f32 %v690_v48, 0.0 }
  0xd1   : > { %v653_v10 = vmul.f32 %v635_v19, %v619_v4  ;;  %v709_v19 = vpop.permute.xlu2 %708 }
  0xd2   : > { %v703_v53 = vpack.c.bf16 %v698_v51, %v696_v50  ;;  %v587_v1 = vpop.f32.mrf.mxu3 }
  0xd3   : > { %v685_v21 = vadd.f32 %v667_v42, %v653_v10 }
  0xd4   : > { %720 = vmatpush.bf16.msrb.mxu1 %v703_v53 }
  0xd5   : > { %v693_v20 = vmax.f32 %v685_v21, 0.0 }
  0xd6   : > { %v606_v56 = vpop.f32.mrf.mxu2  ;;  %v620_v62 = vpop.f32.mrf.mxu0 }
  0xd7   : > { %v621_v3 = vadd.f32 %v620_v62, %v602_v63  ;;  %v607_v5 = vadd.f32 %v606_v56, %v587_v1 }
  0xd8   : > { %721 = vmatpush.bf16.msrb.mxu1 %v701_v57 }
  0xd9   : > { %v655_v8 = vmul.f32 %v640_v33, %v621_v3 }
  0xdb   : > { %982 = vmatmul.msk.bf16.vlgmr.msrb.gmra.mxu1 %vm507_vm0, %v700_v59  ;;  %v687_v14 = vadd.f32 %v672_v40, %v655_v8 }
  0xdd   : > { %v695_v24 = vmax.f32 %v687_v14, 0.0 }
  0xde   : > { %v623_v60 = vpop.f32.mrf.mxu2 }
  0xdf   : > { %v624_v0 = vadd.f32 %v623_v60, %v605_v61  ;;  %v702_v26 = vpack.c.bf16 %v695_v24, %v693_v20 }
  0xe1   : > { %v657_v6 = vmul.f32 %v645_v18, %v624_v0 }
  0xe3   : > { %v689_v12 = vadd.f32 %v1251_v16, %v657_v6 }
  0xe5   : > { %v697_v15 = vmax.f32 %v689_v12, 0.0 }
  0xe6   : > { %v625_v7 = vpop.f32.mrf.mxu2 }
  0xe7   : > { %v626_v9 = vadd.f32 %v625_v7, %v607_v5 }
  0xe9   : > { %v659_v11 = vmul.f32 %v650_v25, %v626_v9 }
  0xeb   : > { %v691_v13 = vadd.f32 %v682_v29, %v659_v11 }
  0xed   : > { %v699_v17 = vmax.f32 %v691_v13, 0.0 }
  0xef   : > { %v704_v22 = vpack.c.bf16 %v699_v17, %v697_v15 }
  0xf1   : > { %733 = vmatpush.bf16.msrb.mxu3 %v704_v22 }
  0xf5   : > { %734 = vmatpush.bf16.msrb.mxu3 %v702_v26 }
  0xf8   : > { %983 = vmatmul.msk.bf16.vlgmr.msrb.gmra.mxu3 %vm507_vm0, %v700_v59 }
 0x158   : > { %v723_v18 = vpop.f32.mrf.mxu1 }
 0x159   : > { %v724_v29 = vadd.f32 %v723_v18, %v709_v19 }
 0x160   : > { %v725_v23 = vpop.f32.mrf.mxu1 }
 0x17b   : > { %v736_v25 = vpop.f32.mrf.mxu3 }
 0x17c   : > { %v737_v16 = vadd.f32 %v736_v25, %v709_v19 }
 0x17e   : > { %v742_v27 = vrot.slane %v737_v16, 4 }
 0x180   : > { %v744_v28 = vsel %vm743_vm1, %v724_v29, %v742_v27 }
 0x181   : > { %746 = vst [vmem:[%s251_s7] sm:$0xff] %v744_v28 }
 0x183   : > { %v738_v30 = vpop.f32.mrf.mxu3 }
 0x184 PF: > { %s16_s21 = sadd.s32 1, %s1050_s21  }
 0x185   : > { %p13_p4 = scmp.ge.s32.totalorder %s16_s21, 4  }
 0x187   :  { %15 = sbr.rel (!%p13_p4) target bundleno = 1 (0x1), region = 74 }

</bundles_post_ra>
